<compile_context>
chip_gen: v7x
topology: tpu7x:2x2x1
jax: 0.10.0
libtpu: 0.0.40
codegen_flags: <defaults>
</compile_context>

<pallas_src>
import functools

import jax
import jax.numpy as jnp
from jax.experimental import pallas as pl
from jax.experimental.pallas import tpu as pltpu

TEMPERATURE = 0.07
BASE_TEMPERATURE = 0.07  # present in the module __init__, unused in forward (kept for parity)
MARGIN = 0.3
_NEG_BIG = -1e30  # mask value for padded prototype columns / invalid rows


def _round_up(x, m):
    return (x + m - 1) // m * m


def _cdiv(a, b):
    return (a + b - 1) // b


def _pcl_loss_kernel(q_ref, pt_ref, flags_ref, out_ref,
                     pos_acc, neg_acc, nval_acc, pcnt_acc,
                     *, num_cls, batch, tile_rows, tiles_per_core):
    step = pl.program_id(1)
    tile = pl.program_id(0) * tiles_per_core + step   # global (unclamped) tile index

    @pl.when(step == 0)
    def _init():
        pos_acc[...] = jnp.zeros_like(pos_acc)
        neg_acc[...] = jnp.zeros_like(neg_acc)
        nval_acc[...] = jnp.zeros_like(nval_acc)
        pcnt_acc[...] = jnp.zeros_like(pcnt_acc)

    # Skip the duplicated clamp-tile entirely (only exists when the tile count is
    # odd and split across two cores); the DMA still happens but costs no compute.
    @pl.when(tile * tile_rows < batch)
    def _accumulate():
        q = q_ref[...]            # (TB, D), native dtype (f32 or bf16)
        pt = pt_ref[...]          # (D, C_pad), resident, pre-scaled by 1/temperature
        flags = flags_ref[...]    # (TB, 1) int32

        # logits = q @ (prototypes/T).T, f32 accumulate on the MXU.
        logits = jnp.dot(q, pt, preferred_element_type=jnp.float32)
        tb, c_pad = logits.shape

        # Row validity: masks the ragged last tile's garbage rows BEFORE exp/log.
        row = tile * tile_rows + jax.lax.broadcasted_iota(jnp.int32, (tb, 1), 0)
        row_valid = row < batch                                  # (TB, 1) bool
        col = jax.lax.broadcasted_iota(jnp.int32, (tb, c_pad), 1)
        real_col = col < num_cls
        masked_logits = jnp.where(real_col & row_valid, logits, _NEG_BIG)

        valid_f = ((flags > 0) & row_valid).astype(jnp.float32)                    # (TB, 1)
        has_pos_f = ((flags > 0) & (flags <= num_cls) & row_valid).astype(jnp.float32)
        pos_col = ((flags - 1) == col) & real_col                                   # (TB, C_pad) bool

        # --- positive term (matches the module: not a true log-softmax) --------
        row_max = jnp.max(masked_logits, axis=1, keepdims=True)                     # (TB, 1)
        exp_sum = jnp.sum(jnp.exp(masked_logits - row_max), axis=1, keepdims=True) + 1e-12
        log_denom = jnp.log(exp_sum)                                                # (TB, 1)
        pos_logit = jnp.sum(jnp.where(pos_col, masked_logits, 0.0),
                            axis=1, keepdims=True)                                  # (TB, 1)
        pos_acc[...] += (pos_logit - log_denom) * has_pos_f

        # --- negative margin term ----------------------------------------------
        # Reference: neg_logits = logits * (1 - pos_mask): positive column -> 0,
        # padded/invalid entries -> -1e30 so they never win the row max.
        neg_vals = jnp.where(pos_col, 0.0, masked_logits)
        neg_max = jnp.max(neg_vals, axis=1, keepdims=True)                           # (TB, 1)
        neg_acc[...] += jnp.maximum(neg_max - MARGIN, 0.0) * valid_f

        nval_acc[...] += valid_f
        pcnt_acc[...] += has_pos_f

    @pl.when(step == pl.num_programs(1) - 1)
    def _finalize():
        # One cross-sublane reduction per quantity, once per core.
        pos_s = jnp.sum(pos_acc[...], keepdims=True)     # (1, 1)
        neg_s = jnp.sum(neg_acc[...], keepdims=True)
        nval_s = jnp.sum(nval_acc[...], keepdims=True)
        pcnt_s = jnp.sum(pcnt_acc[...], keepdims=True)
        lane = jax.lax.broadcasted_iota(jnp.int32, (8, 128), 1)
        packed = jnp.where(lane == 0, pos_s, 0.0)
        packed = jnp.where(lane == 1, neg_s, packed)
        packed = jnp.where(lane == 2, nval_s, packed)
        packed = jnp.where(lane == 3, pcnt_s, packed)
        out_ref[0] = packed                              # per-core partials in row 0, lanes 0..3


def _pcl_loss_impl(output_q, prototypes, flags, *, block_b=4096):
    B, D = output_q.shape
    C = prototypes.shape[0]
    C_pad = _round_up(C, 128)       # one lane tile; do NOT grow this (matmul is not the bottleneck)
    dtype = output_q.dtype          # bf16 callers stay bf16 end-to-end (f32 MXU accumulation)
    itemsize = jnp.dtype(dtype).itemsize

    # --- batch tile: amortize per-grid-step overhead, cap by a v7x-safe VMEM budget ---
    pt_bytes = 2 * D * C_pad * itemsize                            # resident RHS (double-buffer bound)
    per_row = 2 * D * itemsize + 2 * 4 + 4 * 4 + 8 * C_pad * 4      # q dbuf + flags + accs + temps
    budget = 32 * 1024 * 1024                                      # accounted budget (v7x: 64 MiB/TC)
    avail = max(budget - pt_bytes, 8 * per_row)
    tb_cap = max(8, (avail // per_row) // 8 * 8)
    TB = int(min(max(block_b, 8), tb_cap, _round_up(B, 8)))
    TB = max(8, (TB // 8) * 8)

    n_tiles = _cdiv(B, TB)
    n_cores = 2 if n_tiles >= 2 else 1          # v7x megacore split; sequential (harmless) on 1-TC chips
    tiles_per_core = _cdiv(n_tiles, n_cores)

    flags2d = flags.astype(jnp.int32).reshape(B, 1)

    # Prototypes: fold 1/temperature in (tiny resident array, scaled once per call),
    # pre-transpose to a lane-dense (D, C_pad) RHS, pad classes to a lane multiple.
    pt = (prototypes.astype(jnp.float32) * (1.0 / TEMPERATURE)).astype(dtype).T
    if C_pad != C:
        pt = jnp.pad(pt, ((0, 0), (0, C_pad - C)))

    def q_map(c, i):
        # Clamp so the (possible) extra tile of core 1 never issues an OOB block DMA;
        # the kernel masks it out via the unclamped tile index.
        return (jnp.minimum(c * tiles_per_core + i, n_tiles - 1), 0)

    cost = pl.CostEstimate(
        flops=2 * n_cores * tiles_per_core * TB * C_pad * D,
        transcendentals=n_cores * tiles_per_core * TB * C_pad,
        bytes_accessed=B * D * itemsize + D * C_pad * itemsize + B * 4
                       + n_cores * 8 * 128 * 4,
    )

    kernel = functools.partial(
        _pcl_loss_kernel, num_cls=C, batch=B, tile_rows=TB, tiles_per_core=tiles_per_core)

    # TODO(synk): for large D (>=1024) bf16 inputs, sweep pl.Buffered(3) on the q BlockSpec.
    partials = pl.pallas_call(
        kernel,
        out_shape=jax.ShapeDtypeStruct((n_cores, 8, 128), jnp.float32),
        grid=(n_cores, tiles_per_core),
        in_specs=[
            pl.BlockSpec((TB, D), q_map),                    # q: streamed per tile
            pl.BlockSpec((D, C_pad), lambda c, i: (0, 0)),   # prototypes^T: resident
            pl.BlockSpec((TB, 1), q_map),                    # flags per tile
        ],
        out_specs=pl.BlockSpec((1, 8, 128), lambda c, i: (c, 0, 0)),
        scratch_shapes=[
            pltpu.VMEM((TB, 1), jnp.float32),   # per-row positive-term sum
            pltpu.VMEM((TB, 1), jnp.float32),   # per-row negative-term sum
            pltpu.VMEM((TB, 1), jnp.float32),   # per-row valid count
            pltpu.VMEM((TB, 1), jnp.float32),   # per-row positive-mask count
        ],
        compiler_params=pltpu.CompilerParams(
            dimension_semantics=("parallel", "arbitrary"),   # core split x accumulator-carrying batch axis
            vmem_limit_bytes=48 * 1024 * 1024,
        ),
        cost_estimate=cost,
    )(output_q, pt, flags2d)

    # Combine per-core partials (a handful of scalar ops on a (n_cores, 8, 128) array).
    pos_s = jnp.sum(partials[:, 0, 0])
    neg_s = jnp.sum(partials[:, 0, 1])
    nval = jnp.sum(partials[:, 0, 2])
    pcnt = jnp.sum(partials[:, 0, 3])
    pos_loss = -pos_s / (pcnt + 1e-6)                 # matches /(pos_mask.sum() + 1e-6)
    neg_mean = neg_s / jnp.maximum(nval, 1.0)         # .mean() over valid rows
    # PyTorch returns 0.0 when no valid samples exist.
    return jnp.where(nval > 0.0, pos_loss + neg_mean, jnp.float32(0.0))


pcl_loss = jax.jit(_pcl_loss_impl, static_argnames=("block_b",))


def _reference_loss(output_q, prototypes, flags):
    """Pure-JAX (eager) reference matching the PyTorch forward exactly."""
    valid = flags > 0
    q = output_q[valid]
    f = flags[valid]
    if q.shape[0] == 0:
        return jnp.float32(0.0)
    logits = (q.astype(jnp.float32) @ prototypes.astype(jnp.float32).T) / TEMPERATURE
    C = prototypes.shape[0]
    pos_mask = jax.nn.one_hot(f - 1, C, dtype=jnp.float32)
    neg_mask = 1.0 - pos_mask
    pos_logits = logits * pos_mask
    exp_logits = jnp.exp(logits - logits.max(axis=1, keepdims=True))
    log_prob = pos_logits - jnp.log(exp_logits.sum(axis=1, keepdims=True) + 1e-12)
    pos_loss = -(log_prob * pos_mask).sum() / (pos_mask.sum() + 1e-6)
    neg_logits = logits * neg_mask
    neg_max_margin = jnp.maximum(neg_logits.max(axis=1) - MARGIN, 0.0).mean()
    return pos_loss + neg_max_margin


if __name__ == "__main__":
    key = jax.random.PRNGKey(0)
    k1, k2, k3, k4, k5 = jax.random.split(key, 5)

    # --- small shapes consistent with the module docstring -----------------
    B, D, C = 8, 32, 4  # batch, feature dim, number of classes
    output_q = jax.random.normal(k1, (B, D), dtype=jnp.float32)
    prototypes = jax.random.normal(k2, (C, D), dtype=jnp.float32)
    # class ids 1..C; -1 / 0 are background/invalid samples
    flags = jnp.array([1, 2, -1, 3, 0, 4, 2, 1], dtype=jnp.int32)

    loss = pcl_loss(output_q, prototypes, flags)
    jax.block_until_ready(loss)
    ref = _reference_loss(output_q, prototypes, flags)
    assert jnp.allclose(loss, ref, rtol=1e-4, atol=1e-4), (loss, ref)

    # --- larger batch exercising ragged tiling and the 2-core grid split ----
    B2, D2, C2 = 300, 64, 5
    q2 = jax.random.normal(k3, (B2, D2), dtype=jnp.float32)
    p2 = jax.random.normal(k4, (C2, D2), dtype=jnp.float32)
    f2 = jax.random.randint(k5, (B2,), -1, C2 + 1, dtype=jnp.int32)
    loss2 = pcl_loss(q2, p2, f2, block_b=128)   # 3 ragged tiles split over the 2-way core axis
    jax.block_until_ready(loss2)
    ref2 = _reference_loss(q2, p2, f2)
    assert jnp.allclose(loss2, ref2, rtol=1e-4, atol=1e-4), (loss2, ref2)

    print("KERNEL_OK")
</pallas_src>

<mosaic_0001>
module attributes {stable_mosaic.version = 11 : i64} {
  func.func @_pcl_loss_kernel(%arg0: i32, %arg1: i32, %arg2: memref<8x32xf32, #tpu.memory_space<vmem>>, %arg3: memref<32x128xf32, #tpu.memory_space<vmem>>, %arg4: memref<8x1xi32, #tpu.memory_space<vmem>>, %arg5: memref<1x8x128xf32, #tpu.memory_space<vmem>>, %arg6: memref<8x1xf32, #tpu.memory_space<vmem>>, %arg7: memref<8x1xf32, #tpu.memory_space<vmem>>, %arg8: memref<8x1xf32, #tpu.memory_space<vmem>>, %arg9: memref<8x1xf32, #tpu.memory_space<vmem>>) attributes {dimension_semantics = [#tpu.dimension_semantics<parallel>, #tpu.dimension_semantics<arbitrary>], iteration_bounds = array<i64: 1, 1>, scalar_prefetch = 0 : i64, scratch_operands = 4 : i64, tpu.core_type = #tpu.core_type<tc>, window_params = [{transform_indices = @transform_0, window_bounds = array<i64: 8, 32>}, {pipeline_mode = #tpu.pipeline_mode<synchronous>, transform_indices = @transform_1, window_bounds = array<i64: 32, 128>}, {transform_indices = @transform_2, window_bounds = array<i64: 8, 1>}, {transform_indices = @transform_3, window_bounds = array<i64: 1, 8, 128>}]} {
    %c1_i32 = arith.constant 1 : i32
    %0 = arith.muli %arg0, %c1_i32 : i32
    %1 = arith.addi %0, %arg1 : i32
    %c0_i32 = arith.constant 0 : i32
    %2 = arith.cmpi eq, %arg1, %c0_i32 : i32
    %3 = arith.extui %2 : i1 to i32
    %c0_i32_0 = arith.constant 0 : i32
    %4 = arith.cmpi ne, %3, %c0_i32_0 : i32
    scf.if %4 {
      %cst = arith.constant 0.000000e+00 : f32
      %12 = vector.broadcast %cst : f32 to vector<8x1xf32>
      %c0 = arith.constant 0 : index
      %c0_5 = arith.constant 0 : index
      %13 = vector.load %arg6[%c0, %c0_5] : memref<8x1xf32, #tpu.memory_space<vmem>>, vector<8x1xf32>
      tpu.vector_store %arg6[%c0, %c0_5], %12 {strides = array<i32>} : memref<8x1xf32, #tpu.memory_space<vmem>>, vector<8x1xf32>,
      %cst_6 = arith.constant 0.000000e+00 : f32
      %14 = vector.broadcast %cst_6 : f32 to vector<8x1xf32>
      %c0_7 = arith.constant 0 : index
      %c0_8 = arith.constant 0 : index
      %15 = vector.load %arg7[%c0_7, %c0_8] : memref<8x1xf32, #tpu.memory_space<vmem>>, vector<8x1xf32>
      tpu.vector_store %arg7[%c0_7, %c0_8], %14 {strides = array<i32>} : memref<8x1xf32, #tpu.memory_space<vmem>>, vector<8x1xf32>,
      %cst_9 = arith.constant 0.000000e+00 : f32
      %16 = vector.broadcast %cst_9 : f32 to vector<8x1xf32>
      %c0_10 = arith.constant 0 : index
      %c0_11 = arith.constant 0 : index
      %17 = vector.load %arg8[%c0_10, %c0_11] : memref<8x1xf32, #tpu.memory_space<vmem>>, vector<8x1xf32>
      tpu.vector_store %arg8[%c0_10, %c0_11], %16 {strides = array<i32>} : memref<8x1xf32, #tpu.memory_space<vmem>>, vector<8x1xf32>,
      %cst_12 = arith.constant 0.000000e+00 : f32
      %18 = vector.broadcast %cst_12 : f32 to vector<8x1xf32>
      %c0_13 = arith.constant 0 : index
      %c0_14 = arith.constant 0 : index
      %19 = vector.load %arg9[%c0_13, %c0_14] : memref<8x1xf32, #tpu.memory_space<vmem>>, vector<8x1xf32>
      tpu.vector_store %arg9[%c0_13, %c0_14], %18 {strides = array<i32>} : memref<8x1xf32, #tpu.memory_space<vmem>>, vector<8x1xf32>,
    } else {
    }
    %c8_i32 = arith.constant 8 : i32
    %5 = arith.muli %1, %c8_i32 : i32
    %c8_i32_1 = arith.constant 8 : i32
    %6 = arith.cmpi slt, %5, %c8_i32_1 : i32
    %7 = arith.extui %6 : i1 to i32
    %c0_i32_2 = arith.constant 0 : i32
    %8 = arith.cmpi ne, %7, %c0_i32_2 : i32
    scf.if %8 {
      %c0 = arith.constant 0 : index
      %c0_5 = arith.constant 0 : index
      %12 = vector.load %arg2[%c0, %c0_5] : memref<8x32xf32, #tpu.memory_space<vmem>>, vector<8x32xf32>
      %c0_6 = arith.constant 0 : index
      %c0_7 = arith.constant 0 : index
      %13 = vector.load %arg3[%c0_6, %c0_7] : memref<32x128xf32, #tpu.memory_space<vmem>>, vector<32x128xf32>
      %c0_8 = arith.constant 0 : index
      %c0_9 = arith.constant 0 : index
      %14 = vector.load %arg4[%c0_8, %c0_9] : memref<8x1xi32, #tpu.memory_space<vmem>>, vector<8x1xi32>
      %cst = arith.constant dense<0.000000e+00> : vector<8x128xf32>
      %15 = tpu.matmul %12, %13, %cst {dimension_numbers = #tpu.dot_dimension_numbers<[1], [0], [0], [1], [0, 0, 1, 1], [], []>} : vector<8x32xf32>, vector<32x128xf32>, vector<8x128xf32> -> vector<8x128xf32>
      %c8_i32_10 = arith.constant 8 : i32
      %16 = arith.muli %1, %c8_i32_10 : i32
      %17 = tpu.iota {dimensions = array<i32: 0>} : vector<8x1xi32>
      %18 = vector.broadcast %16 : i32 to vector<8x1xi32>
      %19 = arith.addi %18, %17 : vector<8x1xi32>
      %c8_i32_11 = arith.constant 8 : i32
      %20 = vector.broadcast %c8_i32_11 : i32 to vector<8x1xi32>
      %21 = arith.cmpi slt, %19, %20 : vector<8x1xi32>
      %22 = tpu.iota {dimensions = array<i32: 1>} : vector<8x128xi32>
      %c4_i32 = arith.constant 4 : i32
      %23 = vector.broadcast %c4_i32 : i32 to vector<8x128xi32>
      %24 = arith.cmpi slt, %22, %23 : vector<8x128xi32>
      %25 = vector.broadcast %21 : vector<8x1xi1> to vector<8x128xi1>
      %26 = arith.andi %24, %25 : vector<8x128xi1>
      %cst_12 = arith.constant -1.000000e+30 : f32
      %27 = vector.broadcast %cst_12 : f32 to vector<8x128xf32>
      %28 = arith.select %26, %15, %27 : vector<8x128xi1>, vector<8x128xf32>
      %c0_i32_13 = arith.constant 0 : i32
      %29 = vector.broadcast %c0_i32_13 : i32 to vector<8x1xi32>
      %30 = arith.cmpi sgt, %14, %29 : vector<8x1xi32>
      %31 = arith.andi %30, %21 : vector<8x1xi1>
      %32 = arith.extui %31 : vector<8x1xi1> to vector<8x1xi32>
      %33 = arith.sitofp %32 : vector<8x1xi32> to vector<8x1xf32>
      %c0_i32_14 = arith.constant 0 : i32
      %34 = vector.broadcast %c0_i32_14 : i32 to vector<8x1xi32>
      %35 = arith.cmpi sgt, %14, %34 : vector<8x1xi32>
      %c4_i32_15 = arith.constant 4 : i32
      %36 = vector.broadcast %c4_i32_15 : i32 to vector<8x1xi32>
      %37 = arith.cmpi sle, %14, %36 : vector<8x1xi32>
      %38 = arith.andi %35, %37 : vector<8x1xi1>
      %39 = arith.andi %38, %21 : vector<8x1xi1>
      %40 = arith.extui %39 : vector<8x1xi1> to vector<8x1xi32>
      %41 = arith.sitofp %40 : vector<8x1xi32> to vector<8x1xf32>
      %c1_i32_16 = arith.constant 1 : i32
      %42 = vector.broadcast %c1_i32_16 : i32 to vector<8x1xi32>
      %43 = arith.subi %14, %42 : vector<8x1xi32>
      %44 = vector.broadcast %43 : vector<8x1xi32> to vector<8x128xi32>
      %45 = arith.cmpi eq, %44, %22 : vector<8x128xi32>
      %46 = arith.andi %45, %24 : vector<8x128xi1>
      %cst_17 = arith.constant dense<0xFF800000> : vector<8xf32>
      %47 = vector.multi_reduction <maximumf>, %28, %cst_17 [1] : vector<8x128xf32> to vector<8xf32>
      %48 = vector.shape_cast %47 : vector<8xf32> to vector<8x1xf32>
      %49 = vector.broadcast %48 : vector<8x1xf32> to vector<8x128xf32>
      %50 = arith.subf %28, %49 : vector<8x128xf32>
      %51 = math.exp %50 : vector<8x128xf32>
      %cst_18 = arith.constant dense<0.000000e+00> : vector<8xf32>
      %52 = vector.multi_reduction <add>, %51, %cst_18 [1] : vector<8x128xf32> to vector<8xf32>
      %53 = vector.shape_cast %52 : vector<8xf32> to vector<8x1xf32>
      %cst_19 = arith.constant 9.99999996E-13 : f32
      %54 = vector.broadcast %cst_19 : f32 to vector<8x1xf32>
      %55 = arith.addf %53, %54 : vector<8x1xf32>
      %56 = math.log %55 : vector<8x1xf32>
      %cst_20 = arith.constant 0.000000e+00 : f32
      %57 = vector.broadcast %cst_20 : f32 to vector<8x128xf32>
      %58 = arith.select %46, %28, %57 : vector<8x128xi1>, vector<8x128xf32>
      %cst_21 = arith.constant dense<0.000000e+00> : vector<8xf32>
      %59 = vector.multi_reduction <add>, %58, %cst_21 [1] : vector<8x128xf32> to vector<8xf32>
      %60 = vector.shape_cast %59 : vector<8xf32> to vector<8x1xf32>
      %c0_22 = arith.constant 0 : index
      %c0_23 = arith.constant 0 : index
      %61 = vector.load %arg6[%c0_22, %c0_23] : memref<8x1xf32, #tpu.memory_space<vmem>>, vector<8x1xf32>
      %62 = arith.subf %60, %56 : vector<8x1xf32>
      %63 = arith.mulf %62, %41 : vector<8x1xf32>
      %64 = arith.addf %61, %63 : vector<8x1xf32>
      %c0_24 = arith.constant 0 : index
      %c0_25 = arith.constant 0 : index
      %65 = vector.load %arg6[%c0_24, %c0_25] : memref<8x1xf32, #tpu.memory_space<vmem>>, vector<8x1xf32>
      tpu.vector_store %arg6[%c0_24, %c0_25], %64 {strides = array<i32>} : memref<8x1xf32, #tpu.memory_space<vmem>>, vector<8x1xf32>,
      %cst_26 = arith.constant 0.000000e+00 : f32
      %66 = vector.broadcast %cst_26 : f32 to vector<8x128xf32>
      %67 = arith.select %46, %66, %28 : vector<8x128xi1>, vector<8x128xf32>
      %cst_27 = arith.constant dense<0xFF800000> : vector<8xf32>
      %68 = vector.multi_reduction <maximumf>, %67, %cst_27 [1] : vector<8x128xf32> to vector<8xf32>
      %69 = vector.shape_cast %68 : vector<8xf32> to vector<8x1xf32>
      %c0_28 = arith.constant 0 : index
      %c0_29 = arith.constant 0 : index
      %70 = vector.load %arg7[%c0_28, %c0_29] : memref<8x1xf32, #tpu.memory_space<vmem>>, vector<8x1xf32>
      %cst_30 = arith.constant 3.000000e-01 : f32
      %71 = vector.broadcast %cst_30 : f32 to vector<8x1xf32>
      %72 = arith.subf %69, %71 : vector<8x1xf32>
      %cst_31 = arith.constant 0.000000e+00 : f32
      %73 = vector.broadcast %cst_31 : f32 to vector<8x1xf32>
      %74 = arith.maximumf %72, %73 : vector<8x1xf32>
      %75 = arith.mulf %74, %33 : vector<8x1xf32>
      %76 = arith.addf %70, %75 : vector<8x1xf32>
      %c0_32 = arith.constant 0 : index
      %c0_33 = arith.constant 0 : index
      %77 = vector.load %arg7[%c0_32, %c0_33] : memref<8x1xf32, #tpu.memory_space<vmem>>, vector<8x1xf32>
      tpu.vector_store %arg7[%c0_32, %c0_33], %76 {strides = array<i32>} : memref<8x1xf32, #tpu.memory_space<vmem>>, vector<8x1xf32>,
      %c0_34 = arith.constant 0 : index
      %c0_35 = arith.constant 0 : index
      %78 = vector.load %arg8[%c0_34, %c0_35] : memref<8x1xf32, #tpu.memory_space<vmem>>, vector<8x1xf32>
      %79 = arith.addf %78, %33 : vector<8x1xf32>
      %c0_36 = arith.constant 0 : index
      %c0_37 = arith.constant 0 : index
      %80 = vector.load %arg8[%c0_36, %c0_37] : memref<8x1xf32, #tpu.memory_space<vmem>>, vector<8x1xf32>
      tpu.vector_store %arg8[%c0_36, %c0_37], %79 {strides = array<i32>} : memref<8x1xf32, #tpu.memory_space<vmem>>, vector<8x1xf32>,
      %c0_38 = arith.constant 0 : index
      %c0_39 = arith.constant 0 : index
      %81 = vector.load %arg9[%c0_38, %c0_39] : memref<8x1xf32, #tpu.memory_space<vmem>>, vector<8x1xf32>
      %82 = arith.addf %81, %41 : vector<8x1xf32>
      %c0_40 = arith.constant 0 : index
      %c0_41 = arith.constant 0 : index
      %83 = vector.load %arg9[%c0_40, %c0_41] : memref<8x1xf32, #tpu.memory_space<vmem>>, vector<8x1xf32>
      tpu.vector_store %arg9[%c0_40, %c0_41], %82 {strides = array<i32>} : memref<8x1xf32, #tpu.memory_space<vmem>>, vector<8x1xf32>,
    } else {
    }
    %c0_i32_3 = arith.constant 0 : i32
    %9 = arith.cmpi eq, %arg1, %c0_i32_3 : i32
    %10 = arith.extui %9 : i1 to i32
    %c0_i32_4 = arith.constant 0 : i32
    %11 = arith.cmpi ne, %10, %c0_i32_4 : i32
    scf.if %11 {
      %c0 = arith.constant 0 : index
      %c0_5 = arith.constant 0 : index
      %12 = vector.load %arg6[%c0, %c0_5] : memref<8x1xf32, #tpu.memory_space<vmem>>, vector<8x1xf32>
      %13 = vector.shape_cast %12 : vector<8x1xf32> to vector<1x8x1xf32>
      %cst = arith.constant dense<0.000000e+00> : vector<1xf32>
      %14 = vector.multi_reduction <add>, %13, %cst [1, 2] : vector<1x8x1xf32> to vector<1xf32>
      %15 = vector.shape_cast %14 : vector<1xf32> to vector<1x1x1xf32>
      %16 = vector.extract %15[0, 0, 0] : f32 from vector<1x1x1xf32>
      %17 = vector.broadcast %16 : f32 to vector<1x1xf32>
      %c0_6 = arith.constant 0 : index
      %c0_7 = arith.constant 0 : index
      %18 = vector.load %arg7[%c0_6, %c0_7] : memref<8x1xf32, #tpu.memory_space<vmem>>, vector<8x1xf32>
      %19 = vector.shape_cast %18 : vector<8x1xf32> to vector<1x8x1xf32>
      %cst_8 = arith.constant dense<0.000000e+00> : vector<1xf32>
      %20 = vector.multi_reduction <add>, %19, %cst_8 [1, 2] : vector<1x8x1xf32> to vector<1xf32>
      %21 = vector.shape_cast %20 : vector<1xf32> to vector<1x1x1xf32>
      %22 = vector.extract %21[0, 0, 0] : f32 from vector<1x1x1xf32>
      %23 = vector.broadcast %22 : f32 to vector<1x1xf32>
      %c0_9 = arith.constant 0 : index
      %c0_10 = arith.constant 0 : index
      %24 = vector.load %arg8[%c0_9, %c0_10] : memref<8x1xf32, #tpu.memory_space<vmem>>, vector<8x1xf32>
      %25 = vector.shape_cast %24 : vector<8x1xf32> to vector<1x8x1xf32>
      %cst_11 = arith.constant dense<0.000000e+00> : vector<1xf32>
      %26 = vector.multi_reduction <add>, %25, %cst_11 [1, 2] : vector<1x8x1xf32> to vector<1xf32>
      %27 = vector.shape_cast %26 : vector<1xf32> to vector<1x1x1xf32>
      %28 = vector.extract %27[0, 0, 0] : f32 from vector<1x1x1xf32>
      %29 = vector.broadcast %28 : f32 to vector<1x1xf32>
      %c0_12 = arith.constant 0 : index
      %c0_13 = arith.constant 0 : index
      %30 = vector.load %arg9[%c0_12, %c0_13] : memref<8x1xf32, #tpu.memory_space<vmem>>, vector<8x1xf32>
      %31 = vector.shape_cast %30 : vector<8x1xf32> to vector<1x8x1xf32>
      %cst_14 = arith.constant dense<0.000000e+00> : vector<1xf32>
      %32 = vector.multi_reduction <add>, %31, %cst_14 [1, 2] : vector<1x8x1xf32> to vector<1xf32>
      %33 = vector.shape_cast %32 : vector<1xf32> to vector<1x1x1xf32>
      %34 = vector.extract %33[0, 0, 0] : f32 from vector<1x1x1xf32>
      %35 = vector.broadcast %34 : f32 to vector<1x1xf32>
      %36 = tpu.iota {dimensions = array<i32: 1>} : vector<8x128xi32>
      %c0_i32_15 = arith.constant 0 : i32
      %37 = vector.broadcast %c0_i32_15 : i32 to vector<8x128xi32>
      %38 = arith.cmpi eq, %36, %37 : vector<8x128xi32>
      %cst_16 = arith.constant 0.000000e+00 : f32
      %39 = vector.shape_cast %17 : vector<1x1xf32> to vector<1x1xf32>
      %40 = vector.broadcast %39 : vector<1x1xf32> to vector<8x128xf32>
      %41 = vector.broadcast %cst_16 : f32 to vector<8x128xf32>
      %42 = arith.select %38, %40, %41 : vector<8x128xi1>, vector<8x128xf32>
      %c1_i32_17 = arith.constant 1 : i32
      %43 = vector.broadcast %c1_i32_17 : i32 to vector<8x128xi32>
      %44 = arith.cmpi eq, %36, %43 : vector<8x128xi32>
      %45 = vector.shape_cast %23 : vector<1x1xf32> to vector<1x1xf32>
      %46 = vector.broadcast %45 : vector<1x1xf32> to vector<8x128xf32>
      %47 = arith.select %44, %46, %42 : vector<8x128xi1>, vector<8x128xf32>
      %c2_i32 = arith.constant 2 : i32
      %48 = vector.broadcast %c2_i32 : i32 to vector<8x128xi32>
      %49 = arith.cmpi eq, %36, %48 : vector<8x128xi32>
      %50 = vector.shape_cast %29 : vector<1x1xf32> to vector<1x1xf32>
      %51 = vector.broadcast %50 : vector<1x1xf32> to vector<8x128xf32>
      %52 = arith.select %49, %51, %47 : vector<8x128xi1>, vector<8x128xf32>
      %c3_i32 = arith.constant 3 : i32
      %53 = vector.broadcast %c3_i32 : i32 to vector<8x128xi32>
      %54 = arith.cmpi eq, %36, %53 : vector<8x128xi32>
      %55 = vector.shape_cast %35 : vector<1x1xf32> to vector<1x1xf32>
      %56 = vector.broadcast %55 : vector<1x1xf32> to vector<8x128xf32>
      %57 = arith.select %54, %56, %52 : vector<8x128xi1>, vector<8x128xf32>
      %c0_18 = arith.constant 0 : index
      %c0_19 = arith.constant 0 : index
      %c0_20 = arith.constant 0 : index
      %58 = vector.load %arg5[%c0_18, %c0_19, %c0_20] : memref<1x8x128xf32, #tpu.memory_space<vmem>>, vector<1x8x128xf32>
      %59 = vector.shape_cast %58 : vector<1x8x128xf32> to vector<8x128xf32>
      %60 = vector.shape_cast %57 : vector<8x128xf32> to vector<1x8x128xf32>
      tpu.vector_store %arg5[%c0_18, %c0_19, %c0_20], %60 {strides = array<i32>} : memref<1x8x128xf32, #tpu.memory_space<vmem>>, vector<1x8x128xf32>,
    } else {
    }
    return
  }
  func.func @transform_0(%arg0: i32, %arg1: i32) -> (i32, i32) {
    %c1_i32 = arith.constant 1 : i32
    %0 = arith.muli %arg0, %c1_i32 : i32
    %1 = arith.addi %0, %arg1 : i32
    %c0_i32 = arith.constant 0 : i32
    %2 = arith.minsi %1, %c0_i32 : i32
    %c0_i32_0 = arith.constant 0 : i32
    %c0_i32_1 = arith.constant 0 : i32
    return %2, %c0_i32_0 : i32, i32
  }
  func.func @transform_1(%arg0: i32, %arg1: i32) -> (i32, i32) {
    %c0_i32 = arith.constant 0 : i32
    %c0_i32_0 = arith.constant 0 : i32
    %c0_i32_1 = arith.constant 0 : i32
    return %c0_i32, %c0_i32_0 : i32, i32
  }
  func.func @transform_2(%arg0: i32, %arg1: i32) -> (i32, i32) {
    %c1_i32 = arith.constant 1 : i32
    %0 = arith.muli %arg0, %c1_i32 : i32
    %1 = arith.addi %0, %arg1 : i32
    %c0_i32 = arith.constant 0 : i32
    %2 = arith.minsi %1, %c0_i32 : i32
    %c0_i32_0 = arith.constant 0 : i32
    %c0_i32_1 = arith.constant 0 : i32
    return %2, %c0_i32_0 : i32, i32
  }
  func.func @transform_3(%arg0: i32, %arg1: i32) -> (i32, i32, i32) {
    %c0_i32 = arith.constant 0 : i32
    %c0_i32_0 = arith.constant 0 : i32
    %c0_i32_1 = arith.constant 0 : i32
    return %arg0, %c0_i32, %c0_i32_0 : i32, i32, i32
  }
}

</mosaic_0001>

<bundles_post_ra>
// kernel: _pcl_loss_impl.1
= control target key start
LH: loop header
LB: loop body
LE: loop exit
PB: predicated region body
PF: predicated region fallthrough
CT: control target
= control target key end

     0   :  { %v347_v0 = vmov 0.0|0.0   ;;  %vm348_vm0 = vmmov 0   ;;  %v349_v4 = vmov 0.0   ;;  %vm89_vm1 = vcmask 261120   ;;  %s416_s1 = inlined_call_operand.vmem [shape: f32[32,128], index: 1, kind: input, shape index: {}]   ;;  %s417_s0 = inlined_call_operand.vmem [shape: f32[8,32], index: 0, kind: input, shape index: {}]   ;;  %s418_s2 = inlined_call_operand.vmem [shape: s32[8,1], index: 2, kind: input, shape index: {}]   ;;  %s419_s3 = inlined_call_operand.vmem [shape: f32[1,8,128], index: 3, kind: output, shape index: {}]  }
   0x1   :  { %324 = vmatprep.subr.bf16.mxu0 %v347_v0  ;;  %v84_v1 = vld [vmem:[%s416_s1] sm:$0xff]  ;;  %v85_v2 = vld [vmem:[%s416_s1 + $0x8] sm:$0xff]  ;;  %v86_v3 = vld [vmem:[%s416_s1 + $0x10] sm:$0xff]  ;;  %321 = vmatprep.mubr.msk.f32.mxu0 %vm348_vm0, %v349_v4  ;;  %v350_v9 = vmov 0   ;;  %v168_v10 = vlaneseq  ;;  %vm73_vm5 = vcmask 7168  }
   0x2   :  { %v325_v5 = vpack.c.bf16 %v85_v2, %v84_v1  ;;  %v87_v6 = vld [vmem:[%s416_s1 + $0x18] sm:$0xff]  ;;  %v83_v8 = vld [vmem:[%s417_s0] sm:$0xff]  ;;  %342 = vset.pattern.permute.xlu0 %v350_v9  ;;  %75 = vst.msk [vmem:[#allocation3] sm:$0xff] %vm73_vm5, %v349_v4  ;;  %76 = vst.msk [vmem:[#allocation4] sm:$0xff] %vm73_vm5, %v349_v4 }
   0x3   :  { %v328_v7 = vpack.c.bf16 %v87_v6, %v86_v3  ;;  %v386_v11 = vand.u32 127, %v168_v10  ;;  %v88_v15 = vld [vmem:[%s418_s2] sm:$0xff]  ;;  %74 = vst.msk [vmem:[#allocation2] sm:$0xff] %vm73_vm5, %v349_v4  ;;  %77 = vst.msk [vmem:[#allocation5] sm:$0xff] %vm73_vm5, %v349_v4 }
   0x4   :  { %326 = vmatpush3.bf16.msra.mxu0 %v325_v5  ;;  %v306_v16 = vadd.s32 4294967295, %v88_v15  ;;  %vm175_vm6 = vcmp.gt.s32.totalorder %v88_v15, 0  ;;  %vm179_vm7 = vcmp.le.s32.totalorder %v88_v15, 4 }
   0x5   :  { %327 = vmatprep.subr.bf16.mxu0 %v347_v0  ;;  %vm170_vm2 = vcmp.lt.s32.totalorder %v386_v11, 4  ;;  %v304_v24 = vsel %vm175_vm6, 1.0, %v349_v4  ;;  %vm180_vm8 = vmand %vm175_vm6, %vm179_vm7  ;;  %vm274_vm9 = vcmp.eq.s32.totalorder %v386_v11, 0  ;;  %vm277_vm10 = vcmp.eq.s32.totalorder %v386_v11, 1 }
   0x6   :  { %v305_v28 = vsel %vm180_vm8, 1.0, %v349_v4  ;;  %vm280_vm11 = vcmp.eq.s32.totalorder %v386_v11, 2  ;;  %vm283_vm12 = vcmp.eq.s32.totalorder %v386_v11, 3 }
   0x8   :  { %329 = vmatpush3.bf16.msra.mxu0 %v328_v7 }
   0x9   :  { %v218_v25 = vld [vmem:[#allocation4] sm:$0xff]  ;;  %v212_v37 = vld [vmem:[#allocation3] sm:$0xff] }
   0xa   :  { %v219_v26 = vadd.f32 %v304_v24, %v218_v25  ;;  %v221_v27 = vld [vmem:[#allocation5] sm:$0xff]  ;;  %v203_v44 = vld [vmem:[#allocation2] sm:$0xff] }
   0xb   :  { %322 = vmatmul.mubr.msk.f32.vlgmr.msra.gmra.mrb[0].mxu0 %vm89_vm1, %v83_v8  ;;  %v222_v30 = vadd.f32 %v305_v28, %v221_v27 }
   0xc   :  { %220 = vst.msk [vmem:[#allocation4] sm:$0xff] %vm73_vm5, %v219_v26 }
   0xd   :  { %223 = vst.msk [vmem:[#allocation5] sm:$0xff] %vm73_vm5, %v222_v30 }
  0x13   :  { %v250_v29 = vld [vmem:[#allocation4] sm:$0xff] }
  0x14   :  { %v251_v31 = vsel %vm73_vm5, %v250_v29, 0.0  ;;  %v261_v50 = vld [vmem:[#allocation5] sm:$0xff] }
  0x15   :  { %v262_v52 = vsel %vm73_vm5, %v261_v50, 0.0 }
  0xde   :  { %v159_v12 = vpop.f32.mrb[0].mxu0 }
  0xdf   :  { %v174_v13 = vsel %vm170_vm2, %v159_v12, -1e+30  ;;  %v323_v14 = vpop.f32.mrb[1].mxu0 }
  0xe0   :  { %190 = vmax.xlane.f32.xlu0 %v174_v13 }
  0xf6   :  { %186 = vperm.xlu0 %342, %v306_v16  }
 0x16d   :  { %v191_v17 = vpop.xlane.xlu0 %190 }
 0x16e   :  { %v192_v18 = vsub.f32 %v174_v13, %v191_v17 }
 0x170   :  { %v193_v19 = vmul.f32 1.442695, %v192_v18 }
 0x172   :  { %343 = vpow2.f32 %v193_v19 }
 0x175   :  { %v187_v20 = vpop.permute.xlu0 %186 }
 0x176   :  { %vm188_vm3 = vcmp.eq.s32.totalorder %v187_v20, %v386_v11 }
 0x177   :  { %vm189_vm4 = vmand %vm188_vm3, %vm170_vm2 }
 0x178   :  { %v209_v22 = vsel %vm189_vm4, 0.0, %v174_v13  ;;  %v200_v23 = vsel %vm189_vm4, %v174_v13, 0.0 }
 0x17c   :  { %v344_v21 = vpop.eup %343 }
 0x17d   :  { %195 = vadd.xlane.f32.xlu1 %v344_v21 }
 0x181   :  { %210 = vmax.xlane.f32.xlu1 %v209_v22 }
 0x185   :  { %201 = vadd.xlane.f32.xlu1 %v200_v23 }
 0x189   :  { %252 = vadd.xlane.f32.xlu1 %v251_v31 }
 0x20a   :  { %v196_v32 = vpop.xlane.xlu1 %195 }
 0x20b   :  { %v197_v33 = vadd.f32 1e-12, %v196_v32 }
 0x20d   :  { %345 = vlog2.f32 %v197_v33 }
 0x20e   :  { %v211_v34 = vpop.xlane.xlu1 %210 }
 0x20f   :  { %v307_v35 = vadd.f32 -0.3, %v211_v34 }
 0x211   :  { %v214_v36 = vmax.f32 %v307_v35, 0.0 }
 0x212   :  { %v202_v42 = vpop.xlane.xlu1 %201 }
 0x213   :  { %v215_v38 = vmul.f32 %v304_v24, %v214_v36 }
 0x215   :  { %v216_v39 = vadd.f32 %v215_v38, %v212_v37 }
 0x216   :  { %v253_v53 = vpop.xlane.xlu1 %252 }
 0x217   :  { %v346_v40 = vpop.eup %345  ;;  %217 = vst.msk [vmem:[#allocation3] sm:$0xff] %vm73_vm5, %v216_v39  ;;  %v254_v56 = vrot.slane %v253_v53, 4 }
 0x218   :  { %v199_v41 = vmul.f32 0.6931472, %v346_v40 }
 0x219   :  { %v255_v58 = vadd.f32 %v254_v56, %v253_v53 }
 0x21a   :  { %v204_v43 = vsub.f32 %v202_v42, %v199_v41 }
 0x21b   :  { %v256_v61 = vrot.slane %v255_v58, 2 }
 0x21c   :  { %v205_v45 = vmul.f32 %v305_v28, %v204_v43 }
 0x21d   :  { %v257_v4 = vadd.f32 %v256_v61, %v255_v58 }
 0x21e   :  { %v206_v46 = vadd.f32 %v205_v45, %v203_v44  ;;  %v239_v47 = vld [vmem:[#allocation3] sm:$0xff] }
 0x21f   :  { %v240_v48 = vsel %vm73_vm5, %v239_v47, 0.0  ;;  %v258_v10 = vrot.slane %v257_v4, 1 }
 0x220   :  { %208 = vst.msk [vmem:[#allocation2] sm:$0xff] %vm73_vm5, %v206_v46  ;;  %241 = vadd.xlane.f32.xlu1 %v240_v48 }
 0x221   :  { %v259_v15 = vadd.f32 %v258_v10, %v257_v4 }
 0x227   :  { %v227_v49 = vld [vmem:[#allocation2] sm:$0xff] }
 0x228   :  { %v229_v51 = vsel %vm73_vm5, %v227_v49, 0.0 }
 0x229   :  { %230 = vadd.xlane.f32.xlu1 %v229_v51 }
 0x22d   :  { %263 = vadd.xlane.f32.xlu1 %v262_v52 }
 0x2ad   :  { %v242_v54 = vpop.xlane.xlu1 %241 }
 0x2ae   :  { %v243_v55 = vrot.slane %v242_v54, 4 }
 0x2b0   :  { %v244_v57 = vadd.f32 %v243_v55, %v242_v54 }
 0x2b2   :  { %v245_v59 = vrot.slane %v244_v57, 2 }
 0x2b4   :  { %v246_v1 = vadd.f32 %v245_v59, %v244_v57 }
 0x2b6   :  { %v231_v60 = vpop.xlane.xlu1 %230  ;;  %v247_v7 = vrot.slane %v246_v1, 1 }
 0x2b7   :  { %v232_v62 = vrot.slane %v231_v60, 4 }
 0x2b8   :  { %v248_v14 = vadd.f32 %v247_v7, %v246_v1 }
 0x2b9   :  { %v233_v63 = vadd.f32 %v232_v62, %v231_v60 }
 0x2ba   :  { %v264_v0 = vpop.xlane.xlu1 %263 }
 0x2bb   :  { %v234_v2 = vrot.slane %v233_v63, 2  ;;  %v265_v3 = vrot.slane %v264_v0, 4 }
 0x2bd   :  { %v266_v5 = vadd.f32 %v265_v3, %v264_v0  ;;  %v235_v6 = vadd.f32 %v234_v2, %v233_v63 }
 0x2bf   :  { %v267_v8 = vrot.slane %v266_v5, 2  ;;  %v236_v9 = vrot.slane %v235_v6, 1 }
 0x2c1   :  { %v268_v12 = vadd.f32 %v267_v8, %v266_v5  ;;  %v237_v13 = vadd.f32 %v236_v9, %v235_v6 }
 0x2c3   :  { %330 = vpush %v237_v13  ;;  %v269_v16 = vrot.slane %v268_v12, 1 }
 0x2c4   :  { %332 = vpush %v248_v14 }
 0x2c5   :  { %334 = vpush %v259_v15  ;;  %v270_v17 = vadd.f32 %v269_v16, %v268_v12 }
 0x2c7   :  { %336 = vpush %v270_v17 }
 0x2f4   :  { %s331_s0 = spop %330 }
 0x2f5   :  { %v275_v18 = vstv %s331_s0  ;;  %s333_s2 = spop %332 }
 0x2f6   :  { %v276_v19 = vsel %vm274_vm9, %v275_v18, 0.0  ;;  %v278_v20 = vstv %s333_s2  ;;  %s335_s23 = spop %334 }
 0x2f7   :  { %v279_v21 = vsel %vm277_vm10, %v278_v20, %v276_v19  ;;  %v281_v22 = vstv %s335_s23 }
 0x2f8   :  { %v282_v23 = vsel %vm280_vm11, %v281_v22, %v279_v21  ;;  %s337_s24 = spop %336 }
 0x2f9   :  { %v284_v24 = vstv %s337_s24 }
 0x2fa   :  { %v285_v25 = vsel %vm283_vm12, %v284_v24, %v282_v23 }
 0x2fb   :  { %286 = vst [vmem:[%s419_s3] sm:$0xff] %v285_v25 }

</bundles_post_ra>
